<compile_context>
chip_gen: v7x
topology: tpu7x:2x2x1
jax: 0.10.0
libtpu: 0.0.40
codegen_flags: <defaults>
</compile_context>

<pallas_src>
import functools

import jax
import jax.numpy as jnp
from jax.experimental import pallas as pl
from jax.experimental.pallas import tpu as pltpu

LANES = 128
MAX_TILE_ROWS = 1024   # 1024x128 f32 block = 512 KiB; 2 inputs x 2 bufs = 2 MiB VMEM
NUM_CORE_SPLITS = 2    # leading "parallel" grid axis -> uses both TCs on v7x


def _round_up(x, m):
    return (x + m - 1) // m * m


def _bce_kernel(p_ref, t_ref, sum_out, cnt_out, sum_acc, cnt_acc, *,
                ignore_label, rows, tile_rows, tiles_per_core):
    c = pl.program_id(0)   # core-split axis ("parallel")
    i = pl.program_id(1)   # row-tile axis within this core's range ("arbitrary")

    @pl.when(i == 0)
    def _():
        sum_acc[...] = jnp.zeros_like(sum_acc)
        cnt_acc[...] = jnp.zeros_like(cnt_acc)

    x = p_ref[...].astype(jnp.float32)
    z = t_ref[...].astype(jnp.float32)

    # Bounds mask from the *intended* (unclamped) tile index: masks both the
    # ragged last block and any clamped duplicate blocks on the core split.
    tile_idx = c * tiles_per_core + i
    row_in_block = jax.lax.broadcasted_iota(jnp.int32, (tile_rows, LANES), 0)
    global_row = tile_idx * tile_rows + row_in_block
    in_bounds = global_row < rows

    valid = in_bounds & (z >= 0.0) & (z != jnp.float32(ignore_label))

    # Numerically-stable BCE with logits:
    #   l = max(x, 0) - x*z + log(1 + exp(-|x|))
    loss = jnp.maximum(x, 0.0) - x * z + jnp.log1p(jnp.exp(-jnp.abs(x)))
    loss = jnp.where(valid, loss, 0.0)

    # vreg-shaped accumulation (VPU-only); scalar reduce deferred to the end.
    sum_acc[...] += loss.reshape(-1, 8, LANES).sum(axis=0)
    cnt_acc[...] += valid.astype(jnp.float32).reshape(-1, 8, LANES).sum(axis=0)

    @pl.when(i == pl.num_programs(1) - 1)
    def _():
        sum_out[...] = sum_acc[...]
        cnt_out[...] = cnt_acc[...]


def bce_with_logits_loss_2d(predict, target, weight=None, *, size_average=True,
                            ignore_label=255):
    """predict, target: (n, 1, h, w). Returns scalar float32 loss."""
    assert predict.ndim == 4 and target.ndim == 4
    assert predict.shape == target.shape
    # TODO(synk): per-class `weight` rescaling not supported (module default is None).
    assert weight is None

    total = 1
    for d in predict.shape:
        total *= int(d)

    p_flat = predict.reshape(-1)
    t_flat = target.reshape(-1)

    # Only pad the tiny tail needed for a lane-dense (rows, 128) view; padded
    # targets are -1 so they are masked. Native dtype is preserved (bf16
    # passthrough); upcast to f32 happens in-kernel.
    pad = (-total) % LANES
    if pad:
        p_flat = jnp.concatenate([p_flat, jnp.zeros((pad,), p_flat.dtype)])
        t_flat = jnp.concatenate([t_flat, jnp.full((pad,), -1, t_flat.dtype)])
    rows = (total + pad) // LANES

    p2 = p_flat.reshape(rows, LANES)
    t2 = t_flat.reshape(rows, LANES)

    # Large streaming tiles; 16-row alignment keeps bf16 blocks legal too.
    tile_rows = min(MAX_TILE_ROWS, _round_up(rows, 16))
    n_tiles = pl.cdiv(rows, tile_rows)
    tiles_per_core = pl.cdiv(n_tiles, NUM_CORE_SPLITS)

    def in_index_map(c, i):
        # Clamp: out-of-range tiles re-read the last tile; kernel masks them out.
        return (jnp.minimum(c * tiles_per_core + i, n_tiles - 1), 0)

    kernel = functools.partial(
        _bce_kernel, ignore_label=ignore_label, rows=rows,
        tile_rows=tile_rows, tiles_per_core=tiles_per_core)

    sums, cnts = pl.pallas_call(
        kernel,
        out_shape=(
            jax.ShapeDtypeStruct((NUM_CORE_SPLITS * 8, LANES), jnp.float32),
            jax.ShapeDtypeStruct((NUM_CORE_SPLITS * 8, LANES), jnp.float32),
        ),
        grid_spec=pltpu.PrefetchScalarGridSpec(
            num_scalar_prefetch=0,
            grid=(NUM_CORE_SPLITS, tiles_per_core),
            in_specs=[
                pl.BlockSpec((tile_rows, LANES), in_index_map),
                pl.BlockSpec((tile_rows, LANES), in_index_map),
            ],
            out_specs=[
                pl.BlockSpec((8, LANES), lambda c, i: (c, 0)),
                pl.BlockSpec((8, LANES), lambda c, i: (c, 0)),
            ],
            scratch_shapes=[
                pltpu.VMEM((8, LANES), jnp.float32),
                pltpu.VMEM((8, LANES), jnp.float32),
            ],
        ),
        compiler_params=pltpu.CompilerParams(
            dimension_semantics=("parallel", "arbitrary"),
            vmem_limit_bytes=32 * 1024 * 1024),
    )(p2, t2)

    total_sum = jnp.sum(sums)
    total_cnt = jnp.sum(cnts)
    if size_average:
        # Degenerate case (no valid target) -> 0, matching the PyTorch branch.
        return jnp.where(total_cnt > 0.0, total_sum / total_cnt,
                         jnp.zeros_like(total_sum))
    return total_sum


def _reference(predict, target, size_average=True, ignore_label=255):
    x = predict.astype(jnp.float32)
    t = target.astype(jnp.float32)
    mask = jnp.logical_and(t >= 0, t != ignore_label)
    loss = jnp.maximum(x, 0.0) - x * t + jnp.log1p(jnp.exp(-jnp.abs(x)))
    loss = jnp.where(mask, loss, 0.0)
    cnt = jnp.sum(mask.astype(jnp.float32))
    s = jnp.sum(loss)
    if size_average:
        return jnp.where(cnt > 0, s / cnt, 0.0)
    return s


if __name__ == "__main__":
    key = jax.random.PRNGKey(0)

    def make_inputs(k, shape):
        k1, k2, k3 = jax.random.split(k, 3)
        predict = jax.random.normal(k1, shape, dtype=jnp.float32)
        target = (jax.random.uniform(k2, shape) > 0.5).astype(jnp.float32)
        ignore_mask = jax.random.uniform(k3, shape) > 0.8
        target = jnp.where(ignore_mask, jnp.float32(255.0), target)
        return predict, target

    k_a, k_b = jax.random.split(key)

    # Case 1: (n, 1, h, w) = (2, 1, 16, 16), total divisible by 128.
    p_a, t_a = make_inputs(k_a, (2, 1, 16, 16))
    for sa in (True, False):
        out = bce_with_logits_loss_2d(p_a, t_a, size_average=sa, ignore_label=255)
        out = jax.block_until_ready(out)
        ref = _reference(p_a, t_a, size_average=sa, ignore_label=255)
        assert jnp.allclose(out, ref, rtol=1e-5, atol=1e-5), (sa, out, ref)

    # Case 2: ragged total (not a multiple of 128) exercises the tail padding/mask.
    p_b, t_b = make_inputs(k_b, (2, 1, 15, 15))
    out = bce_with_logits_loss_2d(p_b, t_b, size_average=True, ignore_label=255)
    out = jax.block_until_ready(out)
    ref = _reference(p_b, t_b, size_average=True, ignore_label=255)
    assert jnp.allclose(out, ref, rtol=1e-5, atol=1e-5), (out, ref)

    print("KERNEL_OK")
</pallas_src>

<mosaic_0001>
module attributes {stable_mosaic.version = 11 : i64} {
  func.func @_bce_kernel(%arg0: i32, %arg1: i32, %arg2: memref<16x128xf32, #tpu.memory_space<vmem>>, %arg3: memref<16x128xf32, #tpu.memory_space<vmem>>, %arg4: memref<8x128xf32, #tpu.memory_space<vmem>>, %arg5: memref<8x128xf32, #tpu.memory_space<vmem>>, %arg6: memref<8x128xf32, #tpu.memory_space<vmem>>, %arg7: memref<8x128xf32, #tpu.memory_space<vmem>>) attributes {dimension_semantics = [#tpu.dimension_semantics<parallel>, #tpu.dimension_semantics<arbitrary>], iteration_bounds = array<i64: 2, 1>, scalar_prefetch = 0 : i64, scratch_operands = 2 : i64, tpu.core_type = #tpu.core_type<tc>, window_params = [{transform_indices = @transform_0, window_bounds = array<i64: 16, 128>}, {transform_indices = @transform_1, window_bounds = array<i64: 16, 128>}, {transform_indices = @transform_2, window_bounds = array<i64: 8, 128>}, {transform_indices = @transform_3, window_bounds = array<i64: 8, 128>}]} {
    %c0_i32 = arith.constant 0 : i32
    %0 = arith.cmpi eq, %arg1, %c0_i32 : i32
    %1 = arith.extui %0 : i1 to i32
    %c0_i32_0 = arith.constant 0 : i32
    %2 = arith.cmpi ne, %1, %c0_i32_0 : i32
    scf.if %2 {
      %cst_20 = arith.constant 0.000000e+00 : f32
      %46 = vector.broadcast %cst_20 : f32 to vector<8x128xf32>
      %c0_21 = arith.constant 0 : index
      %c0_22 = arith.constant 0 : index
      %47 = vector.load %arg6[%c0_21, %c0_22] : memref<8x128xf32, #tpu.memory_space<vmem>>, vector<8x128xf32>
      tpu.vector_store %arg6[%c0_21, %c0_22], %46 {strides = array<i32>} : memref<8x128xf32, #tpu.memory_space<vmem>>, vector<8x128xf32>,
      %cst_23 = arith.constant 0.000000e+00 : f32
      %48 = vector.broadcast %cst_23 : f32 to vector<8x128xf32>
      %c0_24 = arith.constant 0 : index
      %c0_25 = arith.constant 0 : index
      %49 = vector.load %arg7[%c0_24, %c0_25] : memref<8x128xf32, #tpu.memory_space<vmem>>, vector<8x128xf32>
      tpu.vector_store %arg7[%c0_24, %c0_25], %48 {strides = array<i32>} : memref<8x128xf32, #tpu.memory_space<vmem>>, vector<8x128xf32>,
    } else {
    }
    %c0 = arith.constant 0 : index
    %c0_1 = arith.constant 0 : index
    %3 = vector.load %arg2[%c0, %c0_1] : memref<16x128xf32, #tpu.memory_space<vmem>>, vector<16x128xf32>
    %c0_2 = arith.constant 0 : index
    %c0_3 = arith.constant 0 : index
    %4 = vector.load %arg3[%c0_2, %c0_3] : memref<16x128xf32, #tpu.memory_space<vmem>>, vector<16x128xf32>
    %c1_i32 = arith.constant 1 : i32
    %5 = arith.muli %arg0, %c1_i32 : i32
    %6 = arith.addi %5, %arg1 : i32
    %7 = tpu.iota {dimensions = array<i32: 0>} : vector<16x128xi32>
    %c16_i32 = arith.constant 16 : i32
    %8 = arith.muli %6, %c16_i32 : i32
    %9 = vector.broadcast %8 : i32 to vector<16x128xi32>
    %10 = arith.addi %9, %7 : vector<16x128xi32>
    %c4_i32 = arith.constant 4 : i32
    %11 = vector.broadcast %c4_i32 : i32 to vector<16x128xi32>
    %12 = arith.cmpi slt, %10, %11 : vector<16x128xi32>
    %cst = arith.constant 0.000000e+00 : f32
    %13 = vector.broadcast %cst : f32 to vector<16x128xf32>
    %14 = arith.cmpf oge, %4, %13 : vector<16x128xf32>
    %15 = arith.andi %12, %14 : vector<16x128xi1>
    %cst_4 = arith.constant 2.550000e+02 : f32
    %16 = vector.broadcast %cst_4 : f32 to vector<16x128xf32>
    %17 = arith.cmpf one, %4, %16 : vector<16x128xf32>
    %18 = arith.andi %15, %17 : vector<16x128xi1>
    %cst_5 = arith.constant 0.000000e+00 : f32
    %19 = vector.broadcast %cst_5 : f32 to vector<16x128xf32>
    %20 = arith.maximumf %3, %19 : vector<16x128xf32>
    %21 = arith.mulf %3, %4 : vector<16x128xf32>
    %22 = arith.subf %20, %21 : vector<16x128xf32>
    %23 = math.absf %3 : vector<16x128xf32>
    %cst_6 = arith.constant 0.000000e+00 : f32
    %24 = vector.broadcast %cst_6 : f32 to vector<16x128xf32>
    %25 = arith.subf %24, %23 : vector<16x128xf32>
    %26 = math.exp %25 : vector<16x128xf32>
    %27 = math.log1p %26 : vector<16x128xf32>
    %28 = arith.addf %22, %27 : vector<16x128xf32>
    %cst_7 = arith.constant 0.000000e+00 : f32
    %29 = vector.broadcast %cst_7 : f32 to vector<16x128xf32>
    %30 = arith.select %18, %28, %29 : vector<16x128xi1>, vector<16x128xf32>
    %c0_8 = arith.constant 0 : index
    %c0_9 = arith.constant 0 : index
    %31 = vector.load %arg6[%c0_8, %c0_9] : memref<8x128xf32, #tpu.memory_space<vmem>>, vector<8x128xf32>
    %32 = vector.shape_cast %30 : vector<16x128xf32> to vector<2x8x128xf32>
    %cst_10 = arith.constant dense<0.000000e+00> : vector<8x128xf32>
    %33 = vector.multi_reduction <add>, %32, %cst_10 [0] : vector<2x8x128xf32> to vector<8x128xf32>
    %34 = arith.addf %31, %33 : vector<8x128xf32>
    %c0_11 = arith.constant 0 : index
    %c0_12 = arith.constant 0 : index
    %35 = vector.load %arg6[%c0_11, %c0_12] : memref<8x128xf32, #tpu.memory_space<vmem>>, vector<8x128xf32>
    tpu.vector_store %arg6[%c0_11, %c0_12], %34 {strides = array<i32>} : memref<8x128xf32, #tpu.memory_space<vmem>>, vector<8x128xf32>,
    %c0_13 = arith.constant 0 : index
    %c0_14 = arith.constant 0 : index
    %36 = vector.load %arg7[%c0_13, %c0_14] : memref<8x128xf32, #tpu.memory_space<vmem>>, vector<8x128xf32>
    %37 = arith.extui %18 : vector<16x128xi1> to vector<16x128xi32>
    %38 = arith.sitofp %37 : vector<16x128xi32> to vector<16x128xf32>
    %39 = vector.shape_cast %38 : vector<16x128xf32> to vector<2x8x128xf32>
    %cst_15 = arith.constant dense<0.000000e+00> : vector<8x128xf32>
    %40 = vector.multi_reduction <add>, %39, %cst_15 [0] : vector<2x8x128xf32> to vector<8x128xf32>
    %41 = arith.addf %36, %40 : vector<8x128xf32>
    %c0_16 = arith.constant 0 : index
    %c0_17 = arith.constant 0 : index
    %42 = vector.load %arg7[%c0_16, %c0_17] : memref<8x128xf32, #tpu.memory_space<vmem>>, vector<8x128xf32>
    tpu.vector_store %arg7[%c0_16, %c0_17], %41 {strides = array<i32>} : memref<8x128xf32, #tpu.memory_space<vmem>>, vector<8x128xf32>,
    %c0_i32_18 = arith.constant 0 : i32
    %43 = arith.cmpi eq, %arg1, %c0_i32_18 : i32
    %44 = arith.extui %43 : i1 to i32
    %c0_i32_19 = arith.constant 0 : i32
    %45 = arith.cmpi ne, %44, %c0_i32_19 : i32
    scf.if %45 {
      %c0_20 = arith.constant 0 : index
      %c0_21 = arith.constant 0 : index
      %46 = vector.load %arg6[%c0_20, %c0_21] : memref<8x128xf32, #tpu.memory_space<vmem>>, vector<8x128xf32>
      %c0_22 = arith.constant 0 : index
      %c0_23 = arith.constant 0 : index
      %47 = vector.load %arg4[%c0_22, %c0_23] : memref<8x128xf32, #tpu.memory_space<vmem>>, vector<8x128xf32>
      tpu.vector_store %arg4[%c0_22, %c0_23], %46 {strides = array<i32>} : memref<8x128xf32, #tpu.memory_space<vmem>>, vector<8x128xf32>,
      %c0_24 = arith.constant 0 : index
      %c0_25 = arith.constant 0 : index
      %48 = vector.load %arg7[%c0_24, %c0_25] : memref<8x128xf32, #tpu.memory_space<vmem>>, vector<8x128xf32>
      %c0_26 = arith.constant 0 : index
      %c0_27 = arith.constant 0 : index
      %49 = vector.load %arg5[%c0_26, %c0_27] : memref<8x128xf32, #tpu.memory_space<vmem>>, vector<8x128xf32>
      tpu.vector_store %arg5[%c0_26, %c0_27], %48 {strides = array<i32>} : memref<8x128xf32, #tpu.memory_space<vmem>>, vector<8x128xf32>,
    } else {
    }
    return
  }
  func.func @transform_0(%arg0: i32, %arg1: i32) -> (i32, i32) {
    %c1_i32 = arith.constant 1 : i32
    %0 = arith.muli %arg0, %c1_i32 : i32
    %1 = arith.addi %0, %arg1 : i32
    %c0_i32 = arith.constant 0 : i32
    %2 = arith.minsi %1, %c0_i32 : i32
    %c0_i32_0 = arith.constant 0 : i32
    %c0_i32_1 = arith.constant 0 : i32
    return %2, %c0_i32_0 : i32, i32
  }
  func.func @transform_1(%arg0: i32, %arg1: i32) -> (i32, i32) {
    %c1_i32 = arith.constant 1 : i32
    %0 = arith.muli %arg0, %c1_i32 : i32
    %1 = arith.addi %0, %arg1 : i32
    %c0_i32 = arith.constant 0 : i32
    %2 = arith.minsi %1, %c0_i32 : i32
    %c0_i32_0 = arith.constant 0 : i32
    %c0_i32_1 = arith.constant 0 : i32
    return %2, %c0_i32_0 : i32, i32
  }
  func.func @transform_2(%arg0: i32, %arg1: i32) -> (i32, i32) {
    %c0_i32 = arith.constant 0 : i32
    %c0_i32_0 = arith.constant 0 : i32
    return %arg0, %c0_i32 : i32, i32
  }
  func.func @transform_3(%arg0: i32, %arg1: i32) -> (i32, i32) {
    %c0_i32 = arith.constant 0 : i32
    %c0_i32_0 = arith.constant 0 : i32
    return %arg0, %c0_i32 : i32, i32
  }
}

</mosaic_0001>

<bundles_post_ra>
// kernel: tpu_custom_call.1
= control target key start
LH: loop header
LB: loop body
LE: loop exit
PB: predicated region body
PF: predicated region fallthrough
CT: control target
= control target key end

     0   :  { %9 = vsyncpa [#allocation5], 0  ;;  %s1151_s0 = inlined_call_operand.hbm [shape: f32[4,128], index: 0, kind: input, shape index: {}]   ;;  %s1152_s1 = inlined_call_operand.hbm [shape: f32[4,128], index: 1, kind: input, shape index: {}]   ;;  %s1153_s2 = inlined_call_operand.hbm [shape: f32[16,128], index: 2, kind: output, shape index: {0}]   ;;  %s1154_s3 = inlined_call_operand.hbm [shape: f32[16,128], index: 3, kind: output, shape index: {1}]  }
   0x1   :  { %11 = vsyncpa [#allocation5 + $0x1], 0 }
   0x2   :  { %12 = vsyncpa [#allocation8], 0 }
   0x3   :  { %14 = vsyncpa [#allocation8 + $0x1], 0 }
   0x4   :  { %15 = vsyncpa [#allocation6], 0 }
   0x5   :  { %17 = vsyncpa [#allocation6 + $0x1], 0 }
   0x6   :  { %18 = vsyncpa [#allocation11], 0 }
   0x7   :  { %20 = vsyncpa [#allocation11 + $0x1], 0  ;;  %s901_s12 = smov 0   ;;  %s903_s13 = smov 0  }
   0x8   :  { %s905_s14 = smov 0   ;;  %s907_s15 = smov 0  }
   0x9   :  { %s909_s16 = smov 0   ;;  %s911_s17 = smov 0  }
   0xa   :  { %s913_s18 = smov 0   ;;  %s915_s19 = smov 0  }
   0xb LB: > { %s538_s20 = sadd.s32 4294967295, %s870_s19   ;;  %s539_s21 = sadd.s32 4294967294, %s870_s19   ;;  %s870_s19 = sphi %s915_s19, %s26_s19   ;;  %s866_s18 = sphi %s913_s18, %s1170_s18   ;;  %s862_s17 = sphi %s911_s17, %s1169_s17   ;;  %s858_s16 = sphi %s909_s16, %s1141_s16   ;;  %s854_s15 = sphi %s907_s15, %s1168_s15   ;;  %s850_s14 = sphi %s905_s14, %s1167_s14   ;;  %s846_s13 = sphi %s903_s13, %s1166_s13   ;;  %s842_s12 = sphi %s901_s12, %s1165_s12  }
   0xc   : > { %s38_s22 = sadd.s32 1, %s866_s18  ;;  %p839_p1 = scmp.ne.s32.totalorder %s858_s16, 0 }
   0xd   : > { %p40_p0 = scmp.ge.s32.totalorder %s38_s22, 2  ;;  %p59_p2 = scmp.eq.s32.totalorder %s870_s19, 0 }
   0xe   : > { %p64_p3 = scmp.ne.s32.totalorder %s858_s16, %s854_s15  ;;  %p65_p5 = scmp.eq.s32.totalorder %s538_s20, 0 }
   0xf   : > { %s1172_s22 = smov (%p40_p0, %s38_s22), 0  ;;  %p947_p4 = por %p839_p1, %p59_p2 }
  0x10   : > { %p951_p6 = por %p65_p5, %p64_p3  ;;  %s106_s25 = ssub.s32 %s866_s18, %s1172_s22 }
  0x11   : > { %p107_p7 = scmp.eq.s32.totalorder %s106_s25, 0  ;;  %s109_s26 = sadd.s32 1, %s850_s14 }
  0x12   : > { %p119_p8 = scmp.ne.s32.totalorder %s850_s14, %s846_s13  ;;  %p120_p9 = scmp.eq.s32.totalorder %s538_s20, 1 }
  0x13   : > { %s959_s27 = scalar_select %p107_p7, %s850_s14, %s109_s26  }
  0x14   : > { %p125_p10 = scmp.ne.s32.totalorder %s846_s13, %s842_s12  ;;  %p126_p11 = scmp.eq.s32.totalorder %s539_s21, 1 }
  0x15   : > { %p965_p12 = por %p120_p9, %p119_p8  ;;  %p1155_p0 = scmp.ge.s32.totalorder %s870_s19, 2 }
  0x16   : > { %p969_p13 = por %p126_p11, %p125_p10 }
  0x17   : > { %168 = sbr.rel (%p1155_p0) target bundleno = 84 (0x54), region = 16 }
  0x1e   : > { %171 = sbr.rel (!%p947_p4) target bundleno = 57 (0x39), region = 20 }
  0x25   : > { %185 = vsyncadd [#allocation5], 192  ;;  %s872_s30 = smov [#allocation4]   ;;  %s671_s7 = scalar_lea.hbm %s1151_s0, 64 }
  0x26   : > { %s190_s4 = sshll.u32 %s872_s30, 4  ;;  %p672_p1 = scmp.ne.s32.totalorder %s1151_s0, %s671_s7  ;;  %s191_s4 = int_to_ptr.vmem [resolvable:$true] %s190_s4 }
  0x27   : > { %p677_p2 = scmp.lt.u32.totalorder %s671_s7, %s671_s7  ;;  %p679_p3 = scmp.lt.u32.totalorder %s671_s7, %s1151_s0 }
  0x29   : > { %p680_p5 = por %p679_p3, %p677_p2 }
  0x2b   : > { %p681_p7 = pnand %p680_p5, %p672_p1 }
  0x2d   : > { %684 = shalt.err (!%p681_p7)
}
  0x2e   : > { %s685_s15 = scalar_lea.vmem %s191_s4, 64  ;;  %s691_s20 = scalar_lea.vmem %s191_s4, 512 }
  0x2f   : > { %p686_p8 = scmp.ne.s32.totalorder %s191_s4, %s685_s15  ;;  %p692_p9 = scmp.lt.s32.totalorder %s191_s4, %s191_s4 }
  0x30   : > { %p693_p10 = scmp.lt.s32.totalorder %s691_s20, %s685_s15 }
  0x32   : > { %p694_p11 = por %p693_p10, %p692_p9 }
  0x34   : > { %p695_p0 = pnand %p694_p11, %p686_p8 }
  0x36   : > { %698 = shalt.err (!%p695_p0)
}
  0x37   : > { %s873_s21 = smov 64   ;;  %s874_s25 = smov 4  }
  0x38   : > { %196 = dma.hbm_to_vmem [thread:$0]  %s1151_s0, 64, %s191_s4, [#allocation5], %s873_s21, %s873_s21, %s874_s25  }
  0x39 PF: > { %199 = sbr.rel (!%p947_p4) target bundleno = 84 (0x54), region = 24 }
  0x40   : > { %213 = vsyncadd [#allocation8], 192  ;;  %s875_s5 = smov [#allocation7]   ;;  %s699_s9 = scalar_lea.hbm %s1152_s1, 64 }
  0x41   : > { %s218_s6 = sshll.u32 %s875_s5, 4  ;;  %p700_p0 = scmp.ne.s32.totalorder %s1152_s1, %s699_s9  ;;  %s219_s6 = int_to_ptr.vmem [resolvable:$true] %s218_s6 }
  0x42   : > { %p705_p1 = scmp.lt.u32.totalorder %s699_s9, %s699_s9  ;;  %p707_p2 = scmp.lt.u32.totalorder %s699_s9, %s1152_s1 }
  0x44   : > { %p708_p3 = por %p707_p2, %p705_p1 }
  0x46   : > { %p709_p5 = pnand %p708_p3, %p700_p0 }
  0x48   : > { %712 = shalt.err (!%p709_p5)
}
  0x49   : > { %s713_s23 = scalar_lea.vmem %s219_s6, 64  ;;  %s719_s4 = scalar_lea.vmem %s219_s6, 512 }
  0x4a   : > { %p714_p4 = scmp.ne.s32.totalorder %s219_s6, %s713_s23  ;;  %p720_p7 = scmp.lt.s32.totalorder %s219_s6, %s219_s6 }
  0x4b   : > { %p721_p8 = scmp.lt.s32.totalorder %s719_s4, %s713_s23 }
  0x4d   : > { %p722_p9 = por %p721_p8, %p720_p7 }
  0x4f   : > { %p723_p10 = pnand %p722_p9, %p714_p4 }
  0x51   : > { %726 = shalt.err (!%p723_p10)
}
  0x52   : > { %s876_s21 = smov 64   ;;  %s877_s25 = smov 4  }
  0x53   : > { %224 = dma.hbm_to_vmem [thread:$0]  %s1152_s1, 64, %s219_s6, [#allocation8], %s876_s21, %s876_s21, %s877_s25  }
  0x54 PF: > { %p556_p11 = scmp.ge.s32.totalorder %s870_s19, 1  ;;  %p226_p0 = scmp.lt.s32.totalorder %s870_s19, 3 }
  0x56   : > { %p227_p1 = pnand %p556_p11, %p226_p0 }
  0x57   : > { %s232_s5 = sand.u32 (!%p227_p1), 1, %s858_s16  }
  0x58   : > { %230 = sbr.rel (%p227_p1) target bundleno = 162 (0xa2), region = 28  ;;  %s557_s7 = sshll.u32 (!%p227_p1), %s232_s5, 4 }
  0x59   : > { %s233_s8 = scalar_lea.sflag (!%p227_p1), [#allocation5], %s232_s5  ;;  %s236_s9 = scalar_lea.vmem (!%p227_p1), [#allocation4], %s557_s7 }
  0x5f   : > { %820 = dma.done.wait (%p951_p6), %s233_s8, 256  }
  0x60   : > { %822 = vsyncadd (%p951_p6), %s233_s8, 4294967040  ;;  %s242_s6 = scalar_lea.sflag [#allocation8], %s232_s5  ;;  %s245_s10 = scalar_lea.vmem [#allocation7], %s557_s7 }
  0x61   : > { %824 = dma.done.wait (%p951_p6), %s242_s6, 256  }
  0x62   : > { %826 = vsyncadd (%p951_p6), %s242_s6, 4294967040  ;;  %v301_v0 = vlaneseq  ;;  %s561_s11 = sshll.u32 %s862_s17, 4  ;;  %s1017_s15 = sand.u32 1, %s846_s13   ;;  %v1020_v6 = vld [vmem:[%s236_s9] sm:$0xff]  ;;  %v1022_v7 = vld [vmem:[%s236_s9 + $0x8] sm:$0xff]  ;;  %v878_v16 = vmov 0.0  }
  0x63   : > { %v305_v1 = vstv %s561_s11  ;;  %s559_s20 = sshll.u32 %s1017_s15, 3  ;;  %v1024_v8 = vld [vmem:[%s245_s10] sm:$0xff]  ;;  %v1026_v9 = vld [vmem:[%s245_s10 + $0x8] sm:$0xff]  ;;  %v324_v10 = vand.u32 2147483647, %v1020_v6  ;;  %s566_s4 = sshll.u32 %s862_s17, 7 }
  0x64   : > { %v302_v2 = vshrl.u32 %v301_v0, 7  ;;  %vm310_vm2 = vcmp.ge.f32.partialorder %v1024_v8, 0.0  ;;  %vm314_vm3 = vcmp.ne.f32.partialorder %v1024_v8, 255.0  ;;  %vm311_vm4 = vcmp.ge.f32.partialorder %v1026_v9, 0.0  ;;  %s277_s24 = scalar_lea.vmem [#allocation10], %s559_s20  ;;  %s1056_s26 = scalar_lea.hbm %s1154_s3, %s566_s4 }
  0x65   : > { %vm315_vm6 = vcmp.ne.f32.partialorder %v1026_v9, 255.0  ;;  %v325_v11 = vand.u32 2147483647, %v1022_v7  ;;  %s405_s23 = sshll.u32 %s277_s24, 4  ;;  %v326_v14 = vsub.f32 0.0, %v324_v10  ;;  %s379_s30 = scalar_lea.sflag [#allocation11], %s1017_s15  ;;  %s1049_s23 = int_to_ptr.vmem [resolvable:$true] %s405_s23 }
  0x66   : > { %v303_v3 = vadd.s32 8, %v302_v2  ;;  %v306_v4 = vadd.s32 %v305_v1, %v302_v2  ;;  %s727_s5 = scalar_lea.vmem %s1049_s23, 128  ;;  %s879_s7 = smov [#allocation10]  }
  0x67   : > { %v327_v15 = vsub.f32 0.0, %v325_v11  ;;  %v328_v19 = vmul.f32 1.442695, %v326_v14  ;;  %p728_p6 = scmp.ne.s32.totalorder %s1049_s23, %s727_s5  ;;  %s731_s8 = sshll.u32 %s879_s7, 4  ;;  %s732_s8 = int_to_ptr.vmem [resolvable:$false] %s731_s8 }
  0x68   : > { %v307_v5 = vadd.s32 %v305_v1, %v303_v3  ;;  %vm308_vm0 = vcmp.lt.s32.totalorder %v306_v4, 4  ;;  %s733_s9 = scalar_lea.vmem %s732_s8, 256  ;;  %p734_p5 = scmp.lt.s32.totalorder %s1049_s23, %s732_s8 }
  0x69   : > { %vm312_vm5 = vmand %vm308_vm0, %vm310_vm2  ;;  %v330_v20 = vmul.f32 1.442695, %v327_v15  ;;  %663 = vpow2.f32 %v328_v19  ;;  %p729_p2 = pnand %p728_p6, %p965_p12  ;;  %p735_p4 = scmp.lt.s32.totalorder %s733_s9, %s727_s5 }
  0x6a   : > { %vm309_vm1 = vcmp.lt.s32.totalorder %v307_v5, 4  ;;  %vm1036_vm8 = vmand %vm312_vm5, %vm314_vm3 }
  0x6b   : > { %vm313_vm7 = vmand %vm309_vm1, %vm311_vm4  ;;  %v562_v17 = vsel %vm1036_vm8, 1.0, %v878_v16  ;;  %665 = vpow2.f32 %v330_v20  ;;  %p730_p3 = pneg %p729_p2  ;;  %p736_p7 = por %p735_p4, %p734_p5 }
  0x6c   : > { %vm1041_vm9 = vmand %vm313_vm7, %vm315_vm6 }
  0x6d   : > { %v563_v18 = vsel %vm1041_vm9, 1.0, %v878_v16  ;;  %p737_p8 = pnand %p736_p7, %p730_p3 }
  0x6e   : > { %v363_v21 = vadd.f32 %v563_v18, %v562_v17 }
  0x70   : > { %372 = vst [vmem:[%s277_s24] sm:$0xff] %v363_v21 }
  0x71   : > { %740 = shalt.err (!%p737_p8)
}
  0x72   : > { %s741_s6 = scalar_lea.hbm %s1056_s26, 128  ;;  %s745_s24 = scalar_lea.hbm %s1154_s3, 256 }
  0x73   : > { %p742_p9 = scmp.ne.s32.totalorder %s1056_s26, %s741_s6  ;;  %p746_p0 = scmp.lt.u32.totalorder %s1056_s26, %s1154_s3 }
  0x74   : > { %p747_p1 = scmp.lt.u32.totalorder %s745_s24, %s741_s6  ;;  %p749_p2 = scmp.lt.u32.totalorder %s741_s6, %s1056_s26 }
  0x75   : > { %p743_p10 = pnand %p742_p9, %p965_p12 }
  0x76   : > { %p748_p6 = por %p747_p1, %p746_p0 }
  0x77   : > { %p744_p11 = pneg %p743_p10 }
  0x78   : > { %p750_p3 = por %p749_p2, %p748_p6 }
  0x7a   : > { %p751_p5 = pnand %p750_p3, %p744_p11 }
  0x7c   : > { %754 = shalt.err (!%p751_p5)
}
  0x7d   : > { %575 = dma.vmem_to_hbm [thread:$0]  (%p965_p12), %s1049_s23, 128, %s1056_s26, %s379_s30   ;;  %v664_v22 = vpop.eup %663  ;;  %v318_v29 = vmax.f32 %v1020_v6, 0.0  ;;  %v320_v30 = vmul.f32 %v1024_v8, %v1020_v6  ;;  %v319_v33 = vmax.f32 %v1022_v7, 0.0  ;;  %v321_v34 = vmul.f32 %v1026_v9, %v1022_v7 }
  0x7e   : > { %v666_v23 = vpop.eup %665  ;;  %v332_v24 = vadd.f32 1.0, %v664_v22  ;;  %v335_v26 = vmul.f32 -0.5, %v664_v22  ;;  %v338_v31 = vand.u32 2147483647, %v664_v22  ;;  %s270_s23 = scalar_lea.vmem [#allocation9], %s559_s20  ;;  %s1099_s7 = scalar_lea.hbm %s1153_s2, %s566_s4 }
  0x7f   : > { %v341_v25 = vadd.f32 1.0, %v666_v23  ;;  %v344_v27 = vmul.f32 -0.5, %v666_v23  ;;  %v347_v35 = vand.u32 2147483647, %v666_v23  ;;  %v322_v38 = vsub.f32 %v318_v29, %v320_v30  ;;  %s392_s26 = sshll.u32 %s270_s23, 4  ;;  %s374_s20 = scalar_lea.sflag [#allocation6], %s1017_s15  ;;  %s1092_s26 = int_to_ptr.vmem [resolvable:$true] %s392_s26 }
  0x80   : > { %667 = vlog2.f32 %v332_v24  ;;  %v336_v28 = vadd.f32 1.0, %v335_v26  ;;  %vm339_vm10 = vcmp.lt.f32.partialorder %v338_v31, 0.0004427343  ;;  %v323_v41 = vsub.f32 %v319_v33, %v321_v34  ;;  %s755_s8 = scalar_lea.vmem %s1092_s26, 128  ;;  %s880_s9 = smov [#allocation9]  }
  0x81   : > { %669 = vlog2.f32 %v341_v25  ;;  %v345_v32 = vadd.f32 1.0, %v344_v27  ;;  %vm348_vm11 = vcmp.lt.f32.partialorder %v347_v35, 0.0004427343  ;;  %p756_p4 = scmp.ne.s32.totalorder %s1092_s26, %s755_s8  ;;  %s759_s6 = sshll.u32 %s880_s9, 4  ;;  %s760_s6 = int_to_ptr.vmem [resolvable:$false] %s759_s6 }
  0x82   : > { %v337_v36 = vmul.f32 %v664_v22, %v336_v28  ;;  %s761_s10 = scalar_lea.vmem %s760_s6, 256  ;;  %p762_p9 = scmp.lt.s32.totalorder %s1092_s26, %s760_s6 }
  0x83   : > { %v346_v39 = vmul.f32 %v666_v23, %v345_v32  ;;  %p757_p7 = pnand %p756_p4, %p965_p12  ;;  %p763_p10 = scmp.lt.s32.totalorder %s761_s10, %s755_s8 }
  0x85   : > { %p758_p8 = pneg %p757_p7  ;;  %p764_p11 = por %p763_p10, %p762_p9 }
  0x87   : > { %p765_p0 = pnand %p764_p11, %p758_p8 }
  0x8a   : > { %v668_v37 = vpop.eup %667 }
  0x8b   : > { %v670_v40 = vpop.eup %669  ;;  %v334_v42 = vmul.f32 0.6931472, %v668_v37 }
  0x8c   : > { %v343_v43 = vmul.f32 0.6931472, %v670_v40 }
  0x8d   : > { %v340_v44 = vsel %vm339_vm10, %v337_v36, %v334_v42 }
  0x8e   : > { %v349_v45 = vsel %vm348_vm11, %v346_v39, %v343_v43  ;;  %v350_v46 = vadd.f32 %v340_v44, %v322_v38 }
  0x8f   : > { %v351_v47 = vadd.f32 %v349_v45, %v323_v41 }
  0x90   : > { %v352_v48 = vsel %vm1036_vm8, %v350_v46, 0.0 }
  0x91   : > { %v353_v49 = vsel %vm1041_vm9, %v351_v47, 0.0 }
  0x92   : > { %v355_v50 = vadd.f32 %v353_v49, %v352_v48 }
  0x94   : > { %370 = vst [vmem:[%s270_s23] sm:$0xff] %v355_v50 }
  0x95   : > { %768 = shalt.err (!%p765_p0)
}
  0x96   : > { %s769_s17 = scalar_lea.hbm %s1099_s7, 128  ;;  %s773_s11 = scalar_lea.hbm %s1153_s2, 256 }
  0x97   : > { %p770_p1 = scmp.ne.s32.totalorder %s1099_s7, %s769_s17  ;;  %p774_p3 = scmp.lt.u32.totalorder %s1099_s7, %s1153_s2 }
  0x98   : > { %p775_p5 = scmp.lt.u32.totalorder %s773_s11, %s769_s17  ;;  %p777_p7 = scmp.lt.u32.totalorder %s769_s17, %s1099_s7 }
  0x99   : > { %p771_p6 = pnand %p770_p1, %p965_p12 }
  0x9a   : > { %p776_p4 = por %p775_p5, %p774_p3 }
  0x9b   : > { %p772_p2 = pneg %p771_p6 }
  0x9c   : > { %p778_p8 = por %p777_p7, %p776_p4 }
  0x9e   : > { %p779_p9 = pnand %p778_p8, %p772_p2 }
  0xa0   : > { %782 = shalt.err (!%p779_p9)
}
  0xa1   : > { %574 = dma.vmem_to_hbm [thread:$0]  (%p965_p12), %s1092_s26, 128, %s1099_s7, %s374_s20  }
  0xa2 PF: > { %s417_s25 = sand.u32 1, %s842_s12   ;;  %p1164_p10 = scmp.ge.s32.totalorder %s870_s19, 2 }
  0xa3   : > { %s418_s23 = scalar_lea.sflag [#allocation6], %s417_s25 }
  0xa4   : > { %p579_p11 = pnand %p1164_p10, %p969_p13 }
  0xa6   : > { %828 = dma.done.wait (!%p579_p11), %s418_s23, 128  }
  0xa7   : > { %830 = vsyncadd (!%p579_p11), %s418_s23, 4294967168  ;;  %s427_s30 = scalar_lea.sflag [#allocation11], %s417_s25 }
  0xa8   : > { %832 = dma.done.wait (!%p579_p11), %s427_s30, 128  }
  0xa9   : > { %834 = vsyncadd (!%p579_p11), %s427_s30, 4294967168  ;;  %s26_s19 = sadd.s32 1, %s870_s19   ;;  %s1165_s12 = smov %s846_s13 }
  0xaa   : > { %p23_p0 = scmp.ge.s32.totalorder %s26_s19, 4   ;;  %s1166_s13 = smov %s850_s14 }
  0xab   : > { %s1167_s14 = smov %s959_s27  ;;  %s1168_s15 = smov %s858_s16 }
  0xac   : > { %s1141_s16 = smov 0   ;;  %s1169_s17 = smov %s866_s18 }
  0xad   : > { %s1170_s18 = smov %s1172_s22  ;;  %25 = sbr.rel (!%p23_p0) target bundleno = 11 (0xb), region = 111 }
  0xb4   :  { %432 = vsyncpa [#allocation5], 1 }
  0xb5   :  { %434 = vsyncpa [#allocation5 + $0x1], 1 }
  0xb6   :  { %435 = vsyncpa [#allocation8], 1 }
  0xb7   :  { %437 = vsyncpa [#allocation8 + $0x1], 1 }
  0xb8   :  { %438 = vsyncpa [#allocation6], 1 }
  0xb9   :  { %440 = vsyncpa [#allocation6 + $0x1], 1 }
  0xba   :  { %441 = vsyncpa [#allocation11], 1 }
  0xbb   :  { %443 = vsyncpa [#allocation11 + $0x1], 1 }

</bundles_post_ra>
